<compile_context>
chip_gen: v7x
topology: tpu7x:2x2x1
jax: 0.10.0
libtpu: 0.0.40
codegen_flags: <defaults>
</compile_context>

<pallas_src>
import jax
import jax.numpy as jnp
from jax.experimental import pallas as pl
from jax.experimental.pallas import tpu as pltpu


# ----------------------------------------------------------------------------
# Minimal Mesh container (stand-in for metaras.Mesh)
# ----------------------------------------------------------------------------
class Mesh:
    def __init__(self, vertices, faces, textures, texture_res, texture_type):
        self.vertices = vertices          # (B, N, 3) float32
        self.faces = faces                # (B, F, 3) int32
        self.textures = textures          # (B, F, T, 3) float32
        self.texture_res = texture_res    # int
        self.texture_type = texture_type  # str


# ----------------------------------------------------------------------------
# Pallas kernel: lane-dense affine transform
#   slab row = 128 interleaved vertices [x0 y0 z0 x1 y1 z1 ... x127 y127 z127]
#   out_row  = row @ W + t_row      where W = kron(I_128, rot.T)  (384, 384)
# ----------------------------------------------------------------------------
_VPR = 128                 # vertices per slab row -> 384 lanes (3 * 128)
_LANES = _VPR * 3          # 384, a multiple of 128
_TILE_ROWS = 1024          # 1024 x 384 x 4 B = 1.5 MiB per buffer


def _affine_kernel(w_ref, t_ref, v_ref, o_ref):
    # w_ref: VMEM (384, 384) f32  block-diag replication of rot.T (resident)
    # t_ref: VMEM (1, 384)   f32  tiled translation row (resident)
    # v_ref: VMEM (tile_rows, 384) f32  current vertex slab tile
    # o_ref: VMEM (tile_rows, 384) f32
    out = jnp.dot(v_ref[...], w_ref[...],
                  preferred_element_type=jnp.float32)      # MXU, lane-dense
    o_ref[...] = (out + t_ref[...]).astype(o_ref.dtype)    # full-width store


def transform_vertices_pallas(vertices, rot, trans, tile_rows=_TILE_ROWS):
    """new_v[b, n, :] = v[b, n, :] @ rot.T + trans, via a lane-dense Pallas kernel.

    vertices: (B, N, 3) float32
    rot:      (3, 3)    float32
    trans:    (3,)      float32
    returns   (B, N, 3) float32
    """
    B, N, C = vertices.shape
    assert C == 3
    dtype = vertices.dtype

    # Pad the vertex axis to a multiple of 128 so each slab row holds exactly
    # 128 vertices (padded rows transform to garbage and are sliced off).
    n_pad = ((N + _VPR - 1) // _VPR) * _VPR
    v = vertices
    if n_pad != N:
        v = jnp.pad(v, ((0, 0), (0, n_pad - N), (0, 0)))

    rows = (B * n_pad) // _VPR
    slab = v.reshape(rows, _LANES)                     # free contiguous reshape

    # Row tile: multiple of 8 (masked edge tile) or the full row extent.
    tr = tile_rows if rows >= tile_rows else rows
    grid = (pl.cdiv(rows, tr),)

    # Constants for the interleaved layout.
    rot_t = jnp.asarray(rot, jnp.float32).T                          # (3, 3)
    w = jnp.kron(jnp.eye(_VPR, dtype=jnp.float32), rot_t)           # (384, 384)
    t_row = jnp.tile(jnp.asarray(trans, jnp.float32), _VPR).reshape(1, _LANES)

    cost = pl.CostEstimate(flops=2 * B * N * 9,
                           bytes_accessed=2 * B * N * 3 * 4,
                           transcendentals=0)

    out = pl.pallas_call(
        _affine_kernel,
        out_shape=jax.ShapeDtypeStruct((rows, _LANES), dtype),
        grid=grid,
        in_specs=[
            pl.BlockSpec((_LANES, _LANES), lambda i: (0, 0)),   # W (resident)
            pl.BlockSpec((1, _LANES), lambda i: (0, 0)),        # trans row
            pl.BlockSpec((tr, _LANES), lambda i: (i, 0)),       # vertex slab
        ],
        out_specs=pl.BlockSpec((tr, _LANES), lambda i: (i, 0)),
        compiler_params=pltpu.CompilerParams(
            dimension_semantics=("parallel",)),
        cost_estimate=cost,
    )(w, t_row, slab)

    out = out.reshape(B, n_pad, 3)
    if n_pad != N:
        out = out[:, :N, :]
    return out


# ----------------------------------------------------------------------------
# Transform module (JAX equivalent of metaras.transform.Transform)
# ----------------------------------------------------------------------------
class Transform:
    """Base class: transform() is abstract, forward() rebuilds the Mesh."""

    def transform(self, vertices):
        # TODO(synk): base class is abstract in PyTorch (raises NotImplementedError);
        # concrete behaviour is provided by AffineTransform below.
        raise NotImplementedError()

    def forward(self, mesh):
        new_vertices = self.transform(mesh.vertices)
        return Mesh(new_vertices, mesh.faces, mesh.textures,
                    mesh.texture_res, mesh.texture_type)

    __call__ = forward


class AffineTransform(Transform):
    """Concrete Transform: deterministic rigid transform (rotation + translation)."""

    def __init__(self):
        super().__init__()
        theta = jnp.float32(jnp.pi / 6.0)
        c, s = jnp.cos(theta), jnp.sin(theta)
        self.rot = jnp.array([[c, -s, 0.0],
                              [s,  c, 0.0],
                              [0.0, 0.0, 1.0]], dtype=jnp.float32)
        self.trans = jnp.array([0.1, -0.2, 0.3], dtype=jnp.float32)

    def transform(self, vertices):
        return transform_vertices_pallas(vertices, self.rot, self.trans)


# ----------------------------------------------------------------------------
# Demo / self-check
# ----------------------------------------------------------------------------
if __name__ == "__main__":
    key = jax.random.PRNGKey(0)
    k_v, k_t = jax.random.split(key)

    # N=600 exercises the pad-to-128 + slice-back path (rows = 2*640/128 = 10).
    B, N, F, texture_res = 2, 600, 8, 4
    vertices = jax.random.normal(k_v, (B, N, 3), dtype=jnp.float32)
    faces = jnp.tile(jnp.arange(F * 3, dtype=jnp.int32).reshape(F, 3) % N,
                     (B, 1, 1))                                   # (B, F, 3)
    textures = jax.random.uniform(k_t, (B, F, texture_res ** 2, 3),
                                  dtype=jnp.float32)              # (B, F, T, 3)
    mesh = Mesh(vertices, faces, textures, texture_res, "surface")

    module = AffineTransform()
    out_mesh = module(mesh)
    new_vertices = jax.block_until_ready(out_mesh.vertices)

    # Reference check in plain JAX.
    ref = jnp.einsum("bnk,jk->bnj", vertices, module.rot) + module.trans
    assert new_vertices.shape == (B, N, 3)
    assert jnp.allclose(new_vertices, ref, atol=1e-5, rtol=1e-5)
    assert out_mesh.faces is faces and out_mesh.textures is textures

    # Also exercise the multi-step tiled path (masked edge tile) at small size.
    tiled = jax.block_until_ready(
        transform_vertices_pallas(vertices, module.rot, module.trans,
                                  tile_rows=8))
    assert jnp.allclose(tiled, ref, atol=1e-5, rtol=1e-5)

    print("KERNEL_OK")
</pallas_src>

<mosaic_0001>
module attributes {stable_mosaic.version = 11 : i64} {
  func.func @_affine_kernel(%arg0: i32, %arg1: memref<384x384xf32, #tpu.memory_space<vmem>>, %arg2: memref<1x384xf32, #tpu.memory_space<vmem>>, %arg3: memref<10x384xf32, #tpu.memory_space<vmem>>, %arg4: memref<10x384xf32, #tpu.memory_space<vmem>>) attributes {dimension_semantics = [#tpu.dimension_semantics<parallel>], iteration_bounds = array<i64: 1>, scalar_prefetch = 0 : i64, scratch_operands = 0 : i64, tpu.core_type = #tpu.core_type<tc>, window_params = [{pipeline_mode = #tpu.pipeline_mode<synchronous>, transform_indices = @transform_0, window_bounds = array<i64: 384, 384>}, {pipeline_mode = #tpu.pipeline_mode<synchronous>, transform_indices = @transform_1, window_bounds = array<i64: 1, 384>}, {transform_indices = @transform_2, window_bounds = array<i64: 10, 384>}, {transform_indices = @transform_3, window_bounds = array<i64: 10, 384>}]} {
    %c0 = arith.constant 0 : index
    %c0_0 = arith.constant 0 : index
    %0 = vector.load %arg3[%c0, %c0_0] : memref<10x384xf32, #tpu.memory_space<vmem>>, vector<10x384xf32>
    %c0_1 = arith.constant 0 : index
    %c0_2 = arith.constant 0 : index
    %1 = vector.load %arg1[%c0_1, %c0_2] : memref<384x384xf32, #tpu.memory_space<vmem>>, vector<384x384xf32>
    %cst = arith.constant dense<0.000000e+00> : vector<10x384xf32>
    %2 = tpu.matmul %0, %1, %cst {dimension_numbers = #tpu.dot_dimension_numbers<[1], [0], [0], [1], [0, 0, 1, 1], [], []>} : vector<10x384xf32>, vector<384x384xf32>, vector<10x384xf32> -> vector<10x384xf32>
    %c0_3 = arith.constant 0 : index
    %c0_4 = arith.constant 0 : index
    %3 = vector.load %arg2[%c0_3, %c0_4] : memref<1x384xf32, #tpu.memory_space<vmem>>, vector<1x384xf32>
    %4 = vector.broadcast %3 : vector<1x384xf32> to vector<10x384xf32>
    %5 = arith.addf %2, %4 : vector<10x384xf32>
    %c0_5 = arith.constant 0 : index
    %c0_6 = arith.constant 0 : index
    %6 = vector.load %arg4[%c0_5, %c0_6] : memref<10x384xf32, #tpu.memory_space<vmem>>, vector<10x384xf32>
    tpu.vector_store %arg4[%c0_5, %c0_6], %5 {strides = array<i32>} : memref<10x384xf32, #tpu.memory_space<vmem>>, vector<10x384xf32>,
    return
  }
  func.func @transform_0(%arg0: i32) -> (i32, i32) {
    %c0_i32 = arith.constant 0 : i32
    %c0_i32_0 = arith.constant 0 : i32
    %c0_i32_1 = arith.constant 0 : i32
    return %c0_i32, %c0_i32_0 : i32, i32
  }
  func.func @transform_1(%arg0: i32) -> (i32, i32) {
    %c0_i32 = arith.constant 0 : i32
    %c0_i32_0 = arith.constant 0 : i32
    %c0_i32_1 = arith.constant 0 : i32
    return %c0_i32, %c0_i32_0 : i32, i32
  }
  func.func @transform_2(%arg0: i32) -> (i32, i32) {
    %c0_i32 = arith.constant 0 : i32
    %c0_i32_0 = arith.constant 0 : i32
    return %arg0, %c0_i32 : i32, i32
  }
  func.func @transform_3(%arg0: i32) -> (i32, i32) {
    %c0_i32 = arith.constant 0 : i32
    %c0_i32_0 = arith.constant 0 : i32
    return %arg0, %c0_i32 : i32, i32
  }
}

</mosaic_0001>

<bundles_post_ra>
// kernel: tpu_custom_call.1
= control target key start
LH: loop header
LB: loop body
LE: loop exit
PB: predicated region body
PF: predicated region fallthrough
CT: control target
= control target key end

     0   :  { %8 = vsyncpa [#allocation3], 0  ;;  %s959_s0 = inlined_call_operand.hbm [shape: f32[384,384], index: 0, kind: input, shape index: {}]   ;;  %s960_s1 = inlined_call_operand.vmem [shape: f32[1,384], index: 1, kind: input, shape index: {}]   ;;  %s961_s2 = inlined_call_operand.hbm [shape: f32[10,384], index: 2, kind: input, shape index: {}]   ;;  %s962_s3 = inlined_call_operand.hbm [shape: f32[10,384], index: 3, kind: output, shape index: {}]  }
   0x1   :  { %9 = vsyncpa [#allocation6], 0 }
   0x2   :  { %10 = vsyncpa [#allocation4], 0  ;;  %s875_s12 = smov [#allocation2]   ;;  %s803_s16 = scalar_lea.hbm %s959_s0, 18432 }
   0x3   :  { %s16_s13 = sshll.u32 %s875_s12, 4  ;;  %p804_p0 = scmp.ne.s32.totalorder %s959_s0, %s803_s16  ;;  %s17_s13 = int_to_ptr.vmem [resolvable:$true] %s16_s13 }
   0x4   :  { %p807_p1 = scmp.lt.u32.totalorder %s803_s16, %s959_s0 }
   0x6   :  { %p809_p2 = pnand %p807_p1, %p804_p0 }
   0x8   :  { %812 = shalt.err (!%p809_p2)
}
   0x9   :  { %s813_s21 = scalar_lea.vmem %s17_s13, 18432  ;;  %p818_p4 = scmp.lt.s32.totalorder %s17_s13, %s17_s13 }
   0xa   :  { %p814_p3 = scmp.ne.s32.totalorder %s17_s13, %s813_s21  ;;  %p819_p5 = scmp.lt.s32.totalorder %s813_s21, %s813_s21 }
   0xc   :  { %p820_p6 = por %p819_p5, %p818_p4 }
   0xe   :  { %p821_p7 = pnand %p820_p6, %p814_p3 }
  0x10   :  { %824 = shalt.err (!%p821_p7)
}
  0x11   :  { %s876_s22 = smov 384   ;;  %s877_s23 = smov 24  }
  0x12   :  { %22 = dma.hbm_to_vmem [thread:$0]  %s959_s0, 18432, %s17_s13, [#allocation3], %s876_s22, %s876_s22, %s877_s23  }
  0x13   :  { %s878_s26 = smov [#allocation5]   ;;  %s825_s30 = scalar_lea.hbm %s961_s2, 768 }
  0x14   :  { %s30_s27 = sshll.u32 %s878_s26, 4  ;;  %p826_p8 = scmp.ne.s32.totalorder %s961_s2, %s825_s30  ;;  %s31_s27 = int_to_ptr.vmem [resolvable:$true] %s30_s27 }
  0x15   :  { %p829_p9 = scmp.lt.u32.totalorder %s825_s30, %s961_s2 }
  0x17   :  { %p831_p10 = pnand %p829_p9, %p826_p8 }
  0x19   :  { %834 = shalt.err (!%p831_p10)
}
  0x1a   :  { %s835_s8 = scalar_lea.vmem %s31_s27, 768  ;;  %p840_p12 = scmp.lt.s32.totalorder %s31_s27, %s31_s27 }
  0x1b   :  { %p836_p11 = scmp.ne.s32.totalorder %s31_s27, %s835_s8  ;;  %p841_p13 = scmp.lt.s32.totalorder %s835_s8, %s835_s8 }
  0x1d   :  { %p842_p0 = por %p841_p13, %p840_p12 }
  0x1f   :  { %p843_p1 = pnand %p842_p0, %p836_p11 }
  0x21   :  { %846 = shalt.err (!%p843_p1)
}
  0x22   :  { %36 = dma.hbm_to_vmem [thread:$0]  %s961_s2, 768, %s31_s27, [#allocation6], %s876_s22, %s876_s22, %s877_s23  }
  0x23   :  { %869 = dma.done.wait [#allocation3], 18432  }
  0x24   :  { %870 = vsyncadd [#allocation3], 4294948864 }
  0x25   :  { %871 = dma.done.wait [#allocation6], 768  }
  0x26   :  { %872 = vsyncadd [#allocation6], 4294966528  ;;  %v879_v0 = vmov 0.0   ;;  %v50_v1 = vld [vmem:[#allocation2 + $0x8] sm:$0xff]  ;;  %v53_v2 = vld [vmem:[#allocation2 + $0x20] sm:$0xff] }
  0x27   :  { %351 = vmatprep.mubr.f32.mxu1 %v879_v0  ;;  %v146_v3 = vld [vmem:[#allocation2 + $0x308] sm:$0xff]  ;;  %v629_v4 = vpack.c.bf16 %v53_v2, %v50_v1  ;;  %v149_v5 = vld [vmem:[#allocation2 + $0x320] sm:$0xff]  ;;  %v52_v7 = vld [vmem:[#allocation2 + $0x18] sm:$0xff] }
  0x28   :  { %v49_v6 = vld [vmem:[#allocation2] sm:$0xff]  ;;  %v693_v8 = vpack.c.bf16 %v149_v5, %v146_v3  ;;  %v148_v11 = vld [vmem:[#allocation2 + $0x318] sm:$0xff]  ;;  %v59_v14 = vld [vmem:[#allocation2 + $0x50] sm:$0xff] }
  0x29   :  { %v631_v9 = vpack.c.bf16 %v52_v7, %v49_v6  ;;  %v145_v10 = vld [vmem:[#allocation2 + $0x300] sm:$0xff]  ;;  %v56_v12 = vld [vmem:[#allocation2 + $0x38] sm:$0xff]  ;;  %630 = vmatprep.subr.bf16.mxu0 %v629_v4  ;;  %v155_v16 = vld [vmem:[#allocation2 + $0x350] sm:$0xff] }
  0x2a   :  { %v695_v13 = vpack.c.bf16 %v148_v11, %v145_v10  ;;  %v152_v15 = vld [vmem:[#allocation2 + $0x338] sm:$0xff]  ;;  %694 = vmatprep.subr.bf16.mxu1 %v693_v8  ;;  %v633_v17 = vpack.c.bf16 %v59_v14, %v56_v12  ;;  %v55_v19 = vld [vmem:[#allocation2 + $0x30] sm:$0xff]  ;;  %v58_v20 = vld [vmem:[#allocation2 + $0x48] sm:$0xff] }
  0x2b   :  { %632 = vmatpush1.bf16.msra.mxu0 %v631_v9  ;;  %v697_v18 = vpack.c.bf16 %v155_v16, %v152_v15  ;;  %v151_v21 = vld [vmem:[#allocation2 + $0x330] sm:$0xff]  ;;  %v635_v22 = vpack.c.bf16 %v58_v20, %v55_v19  ;;  %v154_v23 = vld [vmem:[#allocation2 + $0x348] sm:$0xff]  ;;  %v65_v25 = vld [vmem:[#allocation2 + $0x80] sm:$0xff] }
  0x2c   :  { %696 = vmatpush1.bf16.msra.mxu1 %v695_v13  ;;  %v62_v24 = vld [vmem:[#allocation2 + $0x68] sm:$0xff]  ;;  %634 = vmatprep.subr.bf16.mxu0 %v633_v17  ;;  %v699_v26 = vpack.c.bf16 %v154_v23, %v151_v21  ;;  %v161_v29 = vld [vmem:[#allocation2 + $0x380] sm:$0xff]  ;;  %v64_v32 = vld [vmem:[#allocation2 + $0x78] sm:$0xff] }
  0x2d   :  { %698 = vmatprep.subr.bf16.mxu1 %v697_v18  ;;  %v637_v27 = vpack.c.bf16 %v65_v25, %v62_v24  ;;  %v158_v28 = vld [vmem:[#allocation2 + $0x368] sm:$0xff]  ;;  %v61_v30 = vld [vmem:[#allocation2 + $0x60] sm:$0xff]  ;;  %v160_v34 = vld [vmem:[#allocation2 + $0x378] sm:$0xff] }
  0x2e   :  { %v701_v31 = vpack.c.bf16 %v161_v29, %v158_v28  ;;  %v157_v33 = vld [vmem:[#allocation2 + $0x360] sm:$0xff]  ;;  %v639_v35 = vpack.c.bf16 %v64_v32, %v61_v30  ;;  %v68_v36 = vld [vmem:[#allocation2 + $0x98] sm:$0xff]  ;;  %v71_v37 = vld [vmem:[#allocation2 + $0xb0] sm:$0xff] }
  0x2f   :  { %636 = vmatpush1.bf16.msra.mxu0 %v635_v22  ;;  %v164_v38 = vld [vmem:[#allocation2 + $0x398] sm:$0xff]  ;;  %v703_v39 = vpack.c.bf16 %v160_v34, %v157_v33  ;;  %v641_v40 = vpack.c.bf16 %v71_v37, %v68_v36  ;;  %v167_v41 = vld [vmem:[#allocation2 + $0x3b0] sm:$0xff]  ;;  %v70_v43 = vld [vmem:[#allocation2 + $0xa8] sm:$0xff] }
  0x30   :  { %700 = vmatpush1.bf16.msra.mxu1 %v699_v26  ;;  %638 = vmatprep.subr.bf16.mxu0 %v637_v27  ;;  %v67_v42 = vld [vmem:[#allocation2 + $0x90] sm:$0xff]  ;;  %v705_v44 = vpack.c.bf16 %v167_v41, %v164_v38  ;;  %v166_v46 = vld [vmem:[#allocation2 + $0x3a8] sm:$0xff]  ;;  %v77_v48 = vld [vmem:[#allocation2 + $0xe0] sm:$0xff] }
  0x31   :  { %702 = vmatprep.subr.bf16.mxu1 %v701_v31  ;;  %v163_v45 = vld [vmem:[#allocation2 + $0x390] sm:$0xff]  ;;  %v74_v47 = vld [vmem:[#allocation2 + $0xc8] sm:$0xff]  ;;  %v173_v50 = vld [vmem:[#allocation2 + $0x3e0] sm:$0xff]  ;;  %v643_v51 = vpack.c.bf16 %v70_v43, %v67_v42 }
  0x32   :  { %v170_v49 = vld [vmem:[#allocation2 + $0x3c8] sm:$0xff]  ;;  %v707_v52 = vpack.c.bf16 %v166_v46, %v163_v45  ;;  %v645_v53 = vpack.c.bf16 %v77_v48, %v74_v47  ;;  %v73_v54 = vld [vmem:[#allocation2 + $0xc0] sm:$0xff]  ;;  %v76_v55 = vld [vmem:[#allocation2 + $0xd8] sm:$0xff] }
  0x33   :  { %640 = vmatpush1.bf16.msra.mxu0 %v639_v35  ;;  %v169_v56 = vld [vmem:[#allocation2 + $0x3c0] sm:$0xff]  ;;  %v709_v57 = vpack.c.bf16 %v173_v50, %v170_v49  ;;  %v172_v58 = vld [vmem:[#allocation2 + $0x3d8] sm:$0xff]  ;;  %v83_v60 = vld [vmem:[#allocation2 + $0x110] sm:$0xff]  ;;  %v647_v63 = vpack.c.bf16 %v76_v55, %v73_v54 }
  0x34   :  { %704 = vmatpush1.bf16.msra.mxu1 %v703_v39  ;;  %642 = vmatprep.subr.bf16.mxu0 %v641_v40  ;;  %v80_v59 = vld [vmem:[#allocation2 + $0xf8] sm:$0xff]  ;;  %v179_v62 = vld [vmem:[#allocation2 + $0x410] sm:$0xff]  ;;  %v711_v1 = vpack.c.bf16 %v172_v58, %v169_v56  ;;  %v82_v4 = vld [vmem:[#allocation2 + $0x108] sm:$0xff] }
  0x35   :  { %706 = vmatprep.subr.bf16.mxu1 %v705_v44  ;;  %v176_v61 = vld [vmem:[#allocation2 + $0x3f8] sm:$0xff]  ;;  %v649_v2 = vpack.c.bf16 %v83_v60, %v80_v59  ;;  %v79_v3 = vld [vmem:[#allocation2 + $0xf0] sm:$0xff]  ;;  %v178_v7 = vld [vmem:[#allocation2 + $0x408] sm:$0xff] }
  0x36   :  { %v175_v5 = vld [vmem:[#allocation2 + $0x3f0] sm:$0xff]  ;;  %v713_v6 = vpack.c.bf16 %v179_v62, %v176_v61  ;;  %v86_v8 = vld [vmem:[#allocation2 + $0x128] sm:$0xff]  ;;  %v89_v9 = vld [vmem:[#allocation2 + $0x140] sm:$0xff]  ;;  %v651_v12 = vpack.c.bf16 %v82_v4, %v79_v3 }
  0x37   :  { %644 = vmatpush1.bf16.msra.mxu0 %v643_v51  ;;  %v182_v10 = vld [vmem:[#allocation2 + $0x428] sm:$0xff]  ;;  %v185_v11 = vld [vmem:[#allocation2 + $0x440] sm:$0xff]  ;;  %v715_v13 = vpack.c.bf16 %v178_v7, %v175_v5  ;;  %v653_v14 = vpack.c.bf16 %v89_v9, %v86_v8  ;;  %v88_v16 = vld [vmem:[#allocation2 + $0x138] sm:$0xff] }
  0x38   :  { %708 = vmatpush1.bf16.msra.mxu1 %v707_v52  ;;  %646 = vmatprep.subr.bf16.mxu0 %v645_v53  ;;  %v85_v15 = vld [vmem:[#allocation2 + $0x120] sm:$0xff]  ;;  %v717_v18 = vpack.c.bf16 %v185_v11, %v182_v10  ;;  %v184_v19 = vld [vmem:[#allocation2 + $0x438] sm:$0xff]  ;;  %v95_v21 = vld [vmem:[#allocation2 + $0x170] sm:$0xff] }
  0x39   :  { %710 = vmatprep.subr.bf16.mxu1 %v709_v57  ;;  %v181_v17 = vld [vmem:[#allocation2 + $0x420] sm:$0xff]  ;;  %v92_v20 = vld [vmem:[#allocation2 + $0x158] sm:$0xff]  ;;  %v191_v23 = vld [vmem:[#allocation2 + $0x470] sm:$0xff]  ;;  %v655_v24 = vpack.c.bf16 %v88_v16, %v85_v15 }
  0x3a   :  { %v188_v22 = vld [vmem:[#allocation2 + $0x458] sm:$0xff]  ;;  %v719_v25 = vpack.c.bf16 %v184_v19, %v181_v17  ;;  %v657_v26 = vpack.c.bf16 %v95_v21, %v92_v20  ;;  %v91_v27 = vld [vmem:[#allocation2 + $0x150] sm:$0xff]  ;;  %v94_v28 = vld [vmem:[#allocation2 + $0x168] sm:$0xff] }
  0x3b   :  { %648 = vmatpush1.bf16.msra.mxu0 %v647_v63  ;;  %v187_v29 = vld [vmem:[#allocation2 + $0x450] sm:$0xff]  ;;  %v721_v30 = vpack.c.bf16 %v191_v23, %v188_v22  ;;  %v190_v31 = vld [vmem:[#allocation2 + $0x468] sm:$0xff]  ;;  %v101_v33 = vld [vmem:[#allocation2 + $0x1a0] sm:$0xff]  ;;  %v659_v36 = vpack.c.bf16 %v94_v28, %v91_v27 }
  0x3c   :  { %712 = vmatpush1.bf16.msra.mxu1 %v711_v1  ;;  %650 = vmatprep.subr.bf16.mxu0 %v649_v2  ;;  %v98_v32 = vld [vmem:[#allocation2 + $0x188] sm:$0xff]  ;;  %v99_v34 = vld [vmem:[#allocation2 + $0x190] sm:$0xff]  ;;  %v723_v37 = vpack.c.bf16 %v190_v31, %v187_v29  ;;  %v97_v39 = vld [vmem:[#allocation2 + $0x180] sm:$0xff] }
  0x3d   :  { %714 = vmatprep.subr.bf16.mxu1 %v713_v6  ;;  %v102_v35 = vld [vmem:[#allocation2 + $0x1a8] sm:$0xff]  ;;  %v661_v38 = vpack.c.bf16 %v101_v33, %v98_v32  ;;  %v100_v40 = vld [vmem:[#allocation2 + $0x198] sm:$0xff]  ;;  %v51_v41 = vld [vmem:[#allocation2 + $0x10] sm:$0xff] }
  0x3e   :  { %v725_v42 = vpack.c.bf16 %v102_v35, %v99_v34  ;;  %v54_v43 = vld [vmem:[#allocation2 + $0x28] sm:$0xff]  ;;  %v104_v44 = vld [vmem:[#allocation2 + $0x1b8] sm:$0xff]  ;;  %v107_v45 = vld [vmem:[#allocation2 + $0x1d0] sm:$0xff]  ;;  %v663_v49 = vpack.c.bf16 %v100_v40, %v97_v39 }
  0x3f   :  { %652 = vmatpush1.bf16.msra.mxu0 %v651_v12  ;;  %v105_v46 = vld [vmem:[#allocation2 + $0x1c0] sm:$0xff]  ;;  %v108_v47 = vld [vmem:[#allocation2 + $0x1d8] sm:$0xff]  ;;  %v932_v48 = vld [vmem:[#allocation5 + $0x10] sm:$0xff]  ;;  %v727_v50 = vpack.c.bf16 %v54_v43, %v51_v41  ;;  %v665_v51 = vpack.c.bf16 %v107_v45, %v104_v44 }
  0x40   :  { %716 = vmatpush1.bf16.msra.mxu1 %v715_v13  ;;  %654 = vmatprep.subr.bf16.mxu0 %v653_v14  ;;  %v103_v52 = vld [vmem:[#allocation2 + $0x1b0] sm:$0xff]  ;;  %v106_v53 = vld [vmem:[#allocation2 + $0x1c8] sm:$0xff]  ;;  %v57_v54 = vld [vmem:[#allocation2 + $0x40] sm:$0xff]  ;;  %v729_v55 = vpack.c.bf16 %v108_v47, %v105_v46 }
  0x41   :  { %718 = vmatprep.subr.bf16.mxu1 %v717_v18  ;;  %v60_v56 = vld [vmem:[#allocation2 + $0x58] sm:$0xff]  ;;  %v110_v57 = vld [vmem:[#allocation2 + $0x1e8] sm:$0xff]  ;;  %v113_v58 = vld [vmem:[#allocation2 + $0x200] sm:$0xff]  ;;  %v667_v61 = vpack.c.bf16 %v106_v53, %v103_v52 }
  0x42   :  { %v111_v59 = vld [vmem:[#allocation2 + $0x1f0] sm:$0xff]  ;;  %v114_v60 = vld [vmem:[#allocation2 + $0x208] sm:$0xff]  ;;  %v731_v62 = vpack.c.bf16 %v60_v56, %v57_v54  ;;  %v669_v63 = vpack.c.bf16 %v113_v58, %v110_v57  ;;  %v109_v1 = vld [vmem:[#allocation2 + $0x1e0] sm:$0xff] }
  0x43   :  { %656 = vmatpush1.bf16.msra.mxu0 %v655_v24  ;;  %v112_v2 = vld [vmem:[#allocation2 + $0x1f8] sm:$0xff]  ;;  %v63_v3 = vld [vmem:[#allocation2 + $0x70] sm:$0xff]  ;;  %v733_v4 = vpack.c.bf16 %v114_v60, %v111_v59  ;;  %v66_v5 = vld [vmem:[#allocation2 + $0x88] sm:$0xff] }
  0x44   :  { %720 = vmatpush1.bf16.msra.mxu1 %v719_v25  ;;  %658 = vmatprep.subr.bf16.mxu0 %v657_v26  ;;  %v116_v6 = vld [vmem:[#allocation2 + $0x218] sm:$0xff]  ;;  %v119_v7 = vld [vmem:[#allocation2 + $0x230] sm:$0xff]  ;;  %v117_v8 = vld [vmem:[#allocation2 + $0x220] sm:$0xff]  ;;  %v671_v10 = vpack.c.bf16 %v112_v2, %v109_v1  ;;  %v735_v12 = vpack.c.bf16 %v66_v5, %v63_v3 }
  0x45   :  { %722 = vmatprep.subr.bf16.mxu1 %v721_v30  ;;  %v120_v9 = vld [vmem:[#allocation2 + $0x238] sm:$0xff]  ;;  %v115_v11 = vld [vmem:[#allocation2 + $0x210] sm:$0xff]  ;;  %v673_v13 = vpack.c.bf16 %v119_v7, %v116_v6  ;;  %v118_v14 = vld [vmem:[#allocation2 + $0x228] sm:$0xff] }
  0x46   :  { %v69_v15 = vld [vmem:[#allocation2 + $0xa0] sm:$0xff]  ;;  %v936_v16 = vld [vmem:[#allocation5 + $0x28] sm:$0x3]  ;;  %v737_v17 = vpack.c.bf16 %v120_v9, %v117_v8  ;;  %v72_v18 = vld [vmem:[#allocation2 + $0xb8] sm:$0xff]  ;;  %v675_v23 = vpack.c.bf16 %v118_v14, %v115_v11 }
  0x47   :  { %660 = vmatpush1.bf16.msra.mxu0 %v659_v36  ;;  %v122_v19 = vld [vmem:[#allocation2 + $0x248] sm:$0xff]  ;;  %v125_v20 = vld [vmem:[#allocation2 + $0x260] sm:$0xff]  ;;  %v739_v24 = vpack.c.bf16 %v72_v18, %v69_v15  ;;  %v124_v27 = vld [vmem:[#allocation2 + $0x258] sm:$0xff] }
  0x48   :  { %724 = vmatpush1.bf16.msra.mxu1 %v723_v37  ;;  %662 = vmatprep.subr.bf16.mxu0 %v661_v38  ;;  %v126_v21 = vld [vmem:[#allocation2 + $0x268] sm:$0xff]  ;;  %v677_v25 = vpack.c.bf16 %v125_v20, %v122_v19  ;;  %v121_v26 = vld [vmem:[#allocation2 + $0x240] sm:$0xff]  ;;  %v75_v28 = vld [vmem:[#allocation2 + $0xd0] sm:$0xff] }
  0x49   :  { %726 = vmatprep.subr.bf16.mxu1 %v725_v42  ;;  %v44_v22 = vld [vmem:[#allocation5 + $0x8] sm:$0xff]  ;;  %v128_v31 = vld [vmem:[#allocation2 + $0x278] sm:$0xff]  ;;  %v131_v32 = vld [vmem:[#allocation2 + $0x290] sm:$0xff]  ;;  %v679_v35 = vpack.c.bf16 %v124_v27, %v121_v26 }
  0x4a   :  { %274 = vmatprep.mubr.f32.mxu0 %v44_v22  ;;  %v78_v30 = vld [vmem:[#allocation2 + $0xe8] sm:$0xff]  ;;  %v129_v33 = vld [vmem:[#allocation2 + $0x280] sm:$0xff]  ;;  %v132_v34 = vld [vmem:[#allocation2 + $0x298] sm:$0xff]  ;;  %v681_v37 = vpack.c.bf16 %v131_v32, %v128_v31 }
  0x4b   :  { %352 = vmatmul.mubr.f32.vlgmr.msra.gmra.mrb[0].mxu1 %v932_v48  ;;  %664 = vmatpush1.bf16.msra.mxu0 %v663_v49  ;;  %v743_v36 = vpack.c.bf16 %v78_v30, %v75_v28  ;;  %v127_v38 = vld [vmem:[#allocation2 + $0x270] sm:$0xff]  ;;  %v130_v39 = vld [vmem:[#allocation2 + $0x288] sm:$0xff]  ;;  %v81_v40 = vld [vmem:[#allocation2 + $0x100] sm:$0xff]  ;;  %v745_v41 = vpack.c.bf16 %v132_v34, %v129_v33 }
  0x4c   :  { %728 = vmatpush3.bf16.msra.mxu1 %v727_v50  ;;  %666 = vmatprep.subr.bf16.mxu0 %v665_v51  ;;  %v84_v42 = vld [vmem:[#allocation2 + $0x118] sm:$0xff]  ;;  %v134_v43 = vld [vmem:[#allocation2 + $0x2a8] sm:$0xff]  ;;  %v137_v44 = vld [vmem:[#allocation2 + $0x2c0] sm:$0xff]  ;;  %v683_v47 = vpack.c.bf16 %v130_v39, %v127_v38 }
  0x4d   :  { %730 = vmatprep.subr.bf16.mxu1 %v729_v55  ;;  %357 = vmatprep.mubr.f32.mxu1 %v879_v0  ;;  %v123_v0 = vld [vmem:[#allocation2 + $0x250] sm:$0xff]  ;;  %v138_v46 = vld [vmem:[#allocation2 + $0x2c8] sm:$0xff]  ;;  %v747_v49 = vpack.c.bf16 %v84_v42, %v81_v40  ;;  %v685_v50 = vpack.c.bf16 %v137_v44, %v134_v43  ;;  %v133_v51 = vld [vmem:[#allocation2 + $0x2a0] sm:$0xff] }
  0x4e   :  { %v741_v29 = vpack.c.bf16 %v126_v21, %v123_v0  ;;  %v135_v45 = vld [vmem:[#allocation2 + $0x2b0] sm:$0xff]  ;;  %v136_v52 = vld [vmem:[#allocation2 + $0x2b8] sm:$0xff]  ;;  %v90_v55 = vld [vmem:[#allocation2 + $0x148] sm:$0xff] }
  0x4f   :  { %668 = vmatpush1.bf16.msra.mxu0 %v667_v61  ;;  %358 = vmatmul.mubr.f32.gmra.mrb[2].mxu1 %v936_v16  ;;  %v87_v53 = vld [vmem:[#allocation2 + $0x130] sm:$0xff]  ;;  %v749_v54 = vpack.c.bf16 %v138_v46, %v135_v45  ;;  %v140_v56 = vld [vmem:[#allocation2 + $0x2d8] sm:$0xff]  ;;  %v141_v58 = vld [vmem:[#allocation2 + $0x2e0] sm:$0xff]  ;;  %v687_v60 = vpack.c.bf16 %v136_v52, %v133_v51 }
  0x50   :  { %732 = vmatpush3.bf16.msra.mxu1 %v731_v62  ;;  %670 = vmatprep.subr.bf16.mxu0 %v669_v63  ;;  %v143_v57 = vld [vmem:[#allocation2 + $0x2f0] sm:$0xff]  ;;  %v144_v59 = vld [vmem:[#allocation2 + $0x2f8] sm:$0xff]  ;;  %v751_v61 = vpack.c.bf16 %v90_v55, %v87_v53  ;;  %v142_v1 = vld [vmem:[#allocation2 + $0x2e8] sm:$0xff] }
  0x51   :  { %734 = vmatprep.subr.bf16.mxu1 %v733_v4  ;;  %428 = vmatprep.mubr.f32.mxu1 %v44_v22  ;;  %v689_v62 = vpack.c.bf16 %v143_v57, %v140_v56  ;;  %v139_v63 = vld [vmem:[#allocation2 + $0x2d0] sm:$0xff]  ;;  %v753_v2 = vpack.c.bf16 %v144_v59, %v141_v58  ;;  %v93_v3 = vld [vmem:[#allocation2 + $0x160] sm:$0xff]  ;;  %v96_v4 = vld [vmem:[#allocation2 + $0x178] sm:$0xff] }
  0x52   :  { %v147_v5 = vld [vmem:[#allocation2 + $0x310] sm:$0xff]  ;;  %v150_v6 = vld [vmem:[#allocation2 + $0x328] sm:$0xff]  ;;  %v691_v7 = vpack.c.bf16 %v142_v1, %v139_v63  ;;  %v755_v8 = vpack.c.bf16 %v96_v4, %v93_v3  ;;  %v156_v11 = vld [vmem:[#allocation2 + $0x358] sm:$0xff] }
  0x53   :  { %672 = vmatpush1.bf16.msra.mxu0 %v671_v10  ;;  %v757_v9 = vpack.c.bf16 %v150_v6, %v147_v5  ;;  %v153_v10 = vld [vmem:[#allocation2 + $0x340] sm:$0xff]  ;;  %v159_v15 = vld [vmem:[#allocation2 + $0x370] sm:$0xff]  ;;  %v46_v18 = vld [vmem:[#allocation5 + $0x18] sm:$0x3] }
  0x54   :  { %736 = vmatpush3.bf16.msra.mxu1 %v735_v12  ;;  %674 = vmatprep.subr.bf16.mxu0 %v673_v13  ;;  %v43_v12 = vld [vmem:[#allocation5] sm:$0xff]  ;;  %v761_v14 = vpack.c.bf16 %v156_v11, %v153_v10  ;;  %v168_v0 = vld [vmem:[#allocation2 + $0x3b8] sm:$0xff]  ;;  %v171_v22 = vld [vmem:[#allocation2 + $0x3d0] sm:$0xff] }
  0x55   :  { %738 = vmatprep.subr.bf16.mxu1 %v737_v17  ;;  %v47_v13 = vld [vmem:[#allocation5 + $0x20] sm:$0x3]  ;;  %v162_v17 = vld [vmem:[#allocation2 + $0x388] sm:$0xff]  ;;  %v180_v26 = vld [vmem:[#allocation2 + $0x418] sm:$0xff] }
  0x56   :  { %v765_v19 = vpack.c.bf16 %v162_v17, %v159_v15  ;;  %v165_v20 = vld [vmem:[#allocation2 + $0x3a0] sm:$0xff]  ;;  %v183_v28 = vld [vmem:[#allocation2 + $0x430] sm:$0xff]  ;;  %v192_v32 = vld [vmem:[#allocation2 + $0x478] sm:$0xff] }
  0x57   :  { %676 = vmatpush1.bf16.msra.mxu0 %v675_v23  ;;  %v769_v21 = vpack.c.bf16 %v168_v0, %v165_v20  ;;  %v174_v23 = vld [vmem:[#allocation2 + $0x3e8] sm:$0xff]  ;;  %v189_v31 = vld [vmem:[#allocation2 + $0x460] sm:$0xff] }
  0x58   :  { %740 = vmatpush3.bf16.msra.mxu1 %v739_v24  ;;  %678 = vmatprep.subr.bf16.mxu0 %v677_v25  ;;  %v773_v24 = vpack.c.bf16 %v174_v23, %v171_v22  ;;  %v177_v25 = vld [vmem:[#allocation2 + $0x400] sm:$0xff] }
  0x59   :  { %742 = vmatprep.subr.bf16.mxu1 %v741_v29  ;;  %v777_v27 = vpack.c.bf16 %v180_v26, %v177_v25  ;;  %v186_v29 = vld [vmem:[#allocation2 + $0x448] sm:$0xff]  ;;  %v193_v40 = vld [vmem:[%s960_s1] sm:$0x7]  ;;  %s880_s1 = smov [#allocation7]  }
  0x5a   :  { %v781_v30 = vpack.c.bf16 %v186_v29, %v183_v28  ;;  %s525_s11 = sshll.u32 %s880_s1, 4  ;;  %s526_s11 = int_to_ptr.vmem [resolvable:$true] %s525_s11 }
  0x5b   :  { %680 = vmatpush1.bf16.msra.mxu0 %v679_v35  ;;  %s847_s12 = scalar_lea.vmem %s526_s11, 768  ;;  %p852_p3 = scmp.lt.s32.totalorder %s526_s11, %s526_s11 }
  0x5c   :  { %744 = vmatpush3.bf16.msra.mxu1 %v743_v36  ;;  %682 = vmatprep.subr.bf16.mxu0 %v681_v37  ;;  %v195_v37 = vlaneseq  ;;  %p848_p2 = scmp.ne.s32.totalorder %s526_s11, %s847_s12  ;;  %p853_p4 = scmp.lt.s32.totalorder %s847_s12, %s847_s12 }
  0x5d   :  { %746 = vmatprep.subr.bf16.mxu1 %v745_v41 }
  0x5e   :  { %v196_v38 = vshrl.u32 %v195_v37, 7  ;;  %p854_p5 = por %p853_p4, %p852_p3 }
  0x5f   :  { %684 = vmatpush1.bf16.msra.mxu0 %v683_v47 }
  0x60   :  { %748 = vmatpush3.bf16.msra.mxu1 %v747_v49  ;;  %686 = vmatprep.subr.bf16.mxu0 %v685_v50  ;;  %v197_v39 = vsub.s32 0, %v196_v38  ;;  %v201_v41 = vsub.s32 1, %v196_v38  ;;  %p855_p6 = pnand %p854_p5, %p848_p2 }
  0x61   :  { %750 = vmatprep.subr.bf16.mxu1 %v749_v54 }
  0x62   :  { %v198_v42 = vrot.slane %v193_v40, %v197_v39  ;;  %v202_v43 = vrot.slane %v193_v40, %v201_v41 }
  0x63   :  { %688 = vmatpush1.bf16.msra.mxu0 %v687_v60 }
  0x64   :  { %752 = vmatpush3.bf16.msra.mxu1 %v751_v61  ;;  %690 = vmatprep.subr.bf16.mxu0 %v689_v62  ;;  %v205_v62 = vsub.s32 2, %v196_v38 }
  0x65   :  { %754 = vmatprep.subr.bf16.mxu1 %v753_v2 }
  0x66   :  { %v206_v63 = vrot.slane %v193_v40, %v205_v62 }
  0x67   :  { %692 = vmatpush1.bf16.msra.mxu0 %v691_v7 }
  0x68   :  { %756 = vmatpush3.bf16.msra.mxu1 %v755_v8 }
  0x69   :  { %758 = vmatprep.subr.bf16.mxu1 %v757_v9 }
  0x6a   :  { %275 = vmatmul.mubr.f32.vlgmr.msra.gmra.mrb[0].mxu0 %v43_v12 }
  0x6b   :  { %429 = vmatmul.mubr.f32.vlgmr.msra.gmra.mrb[4].mxu1 %v43_v12  ;;  %280 = vmatprep.mubr.f32.mxu0 %v47_v13 }
  0x6c   :  { %760 = vmatpush3.bf16.msra.mxu1 %v757_v9  ;;  %433 = vmatprep.mubr.f32.mxu1 %v47_v13 }
  0x6d   :  { %762 = vmatprep.subr.bf16.mxu1 %v761_v14 }
  0x6e   :  { %281 = vmatmul.mubr.f32.gmra.mrb[2].mxu0 %v46_v18 }
  0x6f   :  { %434 = vmatmul.mubr.f32.gmra.mrb[6].mxu1 %v46_v18 }
  0x70   :  { %764 = vmatpush3.bf16.msra.mxu1 %v761_v14  ;;  %626 = vmatprep.mubr.f32.mxu1 %v932_v48  ;;  %v785_v48 = vpack.c.bf16 %v192_v32, %v189_v31 }
  0x71   :  { %766 = vmatprep.subr.bf16.mxu1 %v765_v19 }
  0x74   :  { %768 = vmatpush3.bf16.msra.mxu1 %v765_v19 }
  0x75   :  { %770 = vmatprep.subr.bf16.mxu1 %v769_v21 }
  0x78   :  { %772 = vmatpush3.bf16.msra.mxu1 %v769_v21 }
  0x79   :  { %774 = vmatprep.subr.bf16.mxu1 %v773_v24 }
  0x7c   :  { %776 = vmatpush3.bf16.msra.mxu1 %v773_v24 }
  0x7d   :  { %778 = vmatprep.subr.bf16.mxu1 %v777_v27 }
  0x80   :  { %780 = vmatpush3.bf16.msra.mxu1 %v777_v27 }
  0x81   :  { %782 = vmatprep.subr.bf16.mxu1 %v781_v30 }
  0x84   :  { %784 = vmatpush3.bf16.msra.mxu1 %v781_v30 }
  0x85   :  { %786 = vmatprep.subr.bf16.mxu1 %v785_v48 }
  0x88   :  { %788 = vmatpush3.bf16.msra.mxu1 %v785_v48 }
  0x8b   :  { %627 = vmatmul.mubr.f32.vlgmr.msra.gmra.mrb[8].mxu1 %v936_v16 }
 0x11e   :  { %v353_v33 = vpop.f32.mrb[0].mxu1 }
 0x11f   :  { %v355_v34 = vpop.f32.mrb[1].mxu1 }
 0x122   :  { %v359_v35 = vpop.f32.mrb[2].mxu1 }
 0x123   :  { %v361_v36 = vpop.f32.mrb[3].mxu1 }
 0x13d   :  { %v276_v44 = vpop.f32.mrb[0].mxu0 }
 0x13e   :  { %v277_v45 = vadd.f32 %v276_v44, %v198_v42  ;;  %v570_v46 = vpop.f32.mrb[4].mxu1  ;;  %v278_v47 = vpop.f32.mrb[1].mxu0 }
 0x13f   :  { %v279_v49 = vadd.f32 %v278_v47, %v202_v43  ;;  %v571_v16 = vpop.f32.mrb[5].mxu1 }
 0x140   :  { %v354_v50 = vadd.f32 %v353_v33, %v277_v45  ;;  %v572_v51 = vadd.f32 %v571_v16, %v570_v46 }
 0x141   :  { %v356_v52 = vadd.f32 %v355_v34, %v279_v49  ;;  %v282_v53 = vpop.f32.mrb[2].mxu0 }
 0x142   :  { %514 = vst [vmem:[#allocation7] sm:$0xff] %v354_v50  ;;  %v283_v54 = vadd.f32 %v282_v53, %v198_v42  ;;  %v284_v55 = vpop.f32.mrb[3].mxu0  ;;  %v573_v56 = vpop.f32.mrb[6].mxu1  ;;  %v431_v3 = vadd.f32 %v572_v51, %v206_v63 }
 0x143   :  { %515 = vst [vmem:[#allocation7 + $0x8] sm:$0xff] %v356_v52  ;;  %v285_v57 = vadd.f32 %v284_v55, %v202_v43  ;;  %v574_v58 = vpop.f32.mrb[7].mxu1 }
 0x144   :  { %v360_v59 = vadd.f32 %v359_v35, %v283_v54  ;;  %v575_v60 = vadd.f32 %v574_v58, %v573_v56 }
 0x145   :  { %v362_v61 = vadd.f32 %v361_v36, %v285_v57 }
 0x146   :  { %517 = vst [vmem:[#allocation7 + $0x18] sm:$0x3] %v360_v59  ;;  %v436_v1 = vadd.f32 %v575_v60, %v206_v63 }
 0x147   :  { %518 = vst [vmem:[#allocation7 + $0x20] sm:$0x3] %v362_v61 }
 0x15e   :  { %v628_v2 = vpop.f32.mrb[8].mxu1 }
 0x15f   :  { %v511_v4 = vadd.f32 %v628_v2, %v436_v1  ;;  %v505_v5 = vpop.f32.mrb[9].mxu1 }
 0x160   :  { %v506_v6 = vadd.f32 %v505_v5, %v431_v3 }
 0x161   :  { %519 = vst [vmem:[#allocation7 + $0x28] sm:$0x3] %v511_v4 }
 0x162   :  { %516 = vst [vmem:[#allocation7 + $0x10] sm:$0xff] %v506_v6 }
 0x163   :  { %858 = shalt.err (!%p855_p6)
}
 0x164   :  { %s859_s15 = scalar_lea.hbm %s962_s3, 768 }
 0x165   :  { %p860_p7 = scmp.ne.s32.totalorder %s962_s3, %s859_s15  ;;  %p863_p8 = scmp.lt.u32.totalorder %s859_s15, %s962_s3 }
 0x167   :  { %p865_p9 = pnand %p863_p8, %p860_p7 }
 0x169   :  { %868 = shalt.err (!%p865_p9)
}
 0x16a   :  { %531 = dma.vmem_to_hbm [thread:$0]  %s526_s11, 768, %s962_s3, [#allocation4], %s876_s22, %s876_s22, %s877_s23  }
 0x16b   :  { %873 = dma.done.wait [#allocation4], 768  }
 0x16c   :  { %874 = vsyncadd [#allocation4], 4294966528 }
 0x16d   :  { %535 = vsyncpa [#allocation3], 1 }
 0x16e   :  { %536 = vsyncpa [#allocation6], 1 }
 0x16f   :  { %537 = vsyncpa [#allocation4], 1 }

</bundles_post_ra>
